<compile_context>
chip_gen: v7x
topology: tpu7x:2x2x1
jax: 0.10.0
libtpu: 0.0.40
codegen_flags: <defaults>
</compile_context>

<pallas_src>
import functools

import jax
import jax.numpy as jnp
from jax.experimental import pallas as pl
from jax.experimental.pallas import tpu as pltpu


# ------------------------------- utilities -------------------------------- #
def _round_up(x, m):
    return ((x + m - 1) // m) * m


def _vmem_limit_bytes():
    # Default scoped VMEM (16/32 MiB) is far below physical (128/128/64 MiB on
    # v5e/v6e/v7x); use ~3/4 of physical so big, well-pipelined tiles fit.
    try:
        return int(pltpu.get_tpu_info().vmem_capacity_bytes * 3 // 4)
    except Exception:
        return 48 * 1024 * 1024


def _pick_tile(dim, align, tmax):
    """Return (tile, padded_dim). tile is a multiple of `align`; if the aligned
    dim fits in tmax it is used whole, otherwise prefer the largest tile that
    divides the aligned dim exactly (no padding waste), else pad to tmax."""
    dp = _round_up(dim, align)
    if dp <= tmax:
        return dp, dp
    t = (tmax // align) * align
    lo = max(align, tmax // 4)
    while t >= lo:
        if dp % t == 0:
            return t, dp
        t -= align
    t = (tmax // align) * align
    return t, _round_up(dp, t)


# ----------------------------- Pallas kernel ------------------------------ #
def _gemm_bias_act_kernel(x_ref, w_ref, b_ref, o_ref, acc_ref, *, act):
    k = pl.program_id(2)

    @pl.when(k == 0)
    def _():
        acc_ref[...] = jnp.zeros_like(acc_ref)

    acc_ref[...] += jnp.dot(x_ref[...], w_ref[...],
                            preferred_element_type=jnp.float32)

    @pl.when(k == pl.num_programs(2) - 1)
    def _():
        out = acc_ref[...] + b_ref[...]
        if act == "leaky_relu":
            out = jnp.where(out >= 0.0, out, 0.1 * out)
        elif act == "relu":
            out = jnp.maximum(out, 0.0)
        o_ref[...] = out.astype(o_ref.dtype)


def gemm_bias_act(x, w, b, act="none", out_dtype=jnp.float32,
                  tm_max=256, tn_max=512, tk_max=1024):
    """y = act(x @ w + b).  x: (M, K), w: (K, N), b: (N,).

    x/w are streamed as bf16 through the MXU; accumulation is f32 in a VMEM
    scratch across a K ("arbitrary") grid axis; M/N axes are "parallel".
    """
    M, K = x.shape
    K2, N = w.shape
    assert K == K2 and b.shape == (N,)

    tm, Mp = _pick_tile(M, 8, tm_max)
    tn, Np = _pick_tile(N, 128, tn_max)
    tk, Kp = _pick_tile(K, 128, tk_max)

    # v7x has 2 TensorCores: avoid a single (M, N) block when M is big enough
    # to split, so both cores get a parallel block.
    if (Mp // tm) * (Np // tn) == 1 and Mp >= 16:
        tm = _round_up((Mp + 1) // 2, 8)
        Mp = _round_up(Mp, tm)

    xp = jnp.pad(x, ((0, Mp - M), (0, Kp - K))).astype(jnp.bfloat16)
    wp = jnp.pad(w, ((0, Kp - K), (0, Np - N))).astype(jnp.bfloat16)
    bp = jnp.pad(b.astype(jnp.float32), (0, Np - N)).reshape(1, Np)

    kernel = functools.partial(_gemm_bias_act_kernel, act=act)
    out = pl.pallas_call(
        kernel,
        out_shape=jax.ShapeDtypeStruct((Mp, Np), out_dtype),
        grid_spec=pltpu.PrefetchScalarGridSpec(
            num_scalar_prefetch=0,
            grid=(Mp // tm, Np // tn, Kp // tk),
            in_specs=[
                pl.BlockSpec((tm, tk), lambda i, j, k: (i, k)),
                pl.BlockSpec((tk, tn), lambda i, j, k: (k, j)),
                pl.BlockSpec((1, tn), lambda i, j, k: (0, j)),
            ],
            out_specs=pl.BlockSpec((tm, tn), lambda i, j, k: (i, j)),
            scratch_shapes=[pltpu.VMEM((tm, tn), jnp.float32)],
        ),
        compiler_params=pltpu.CompilerParams(
            dimension_semantics=("parallel", "parallel", "arbitrary"),
            vmem_limit_bytes=_vmem_limit_bytes(),
        ),
    )(xp, wp, bp)
    return out[:M, :N]


# ------------------------------- JAX glue --------------------------------- #
def _im2col_3x3(x):
    """x: (B, C, H, W) NCHW -> patches (B*H*W, C*9), col order (c, kh, kw)."""
    B, C, H, W = x.shape
    xp = jnp.pad(x, ((0, 0), (0, 0), (1, 1), (1, 1)))
    taps = [xp[:, :, kh:kh + H, kw:kw + W]          # (B, C, H, W)
            for kh in range(3) for kw in range(3)]
    p = jnp.stack(taps, axis=2)                     # (B, C, 9, H, W)
    p = p.transpose(0, 3, 4, 1, 2)                  # (B, H, W, C, 9)
    return p.reshape(B * H * W, C * 9)              # rows (b,h,w), cols (c,kh,kw)


def prepare_params(params, grid_size):
    """One-time weight preprocessing (outside the per-step path):
    fold BN into the conv, lay the conv weight out for the im2col GEMM, permute
    fc1's rows so it consumes the conv output in its natural (b, h, w, c)
    flatten order (removes the activation transpose between the two GEMMs),
    and cast all streamed weights to bf16."""
    gh, gw = grid_size
    scale = params["bn_gamma"] / jnp.sqrt(params["bn_var"] + 1e-5)
    w_eff = params["conv_w"] * scale[:, None, None, None]       # (Cout, Cin, 3, 3)
    b_eff = params["bn_beta"] - params["bn_mean"] * scale
    c_out = w_eff.shape[0]
    hidden = params["fc1_w"].shape[1]

    conv_w = w_eff.reshape(c_out, -1).T.astype(jnp.bfloat16)    # (Cin*9, Cout)
    fc1_w = (params["fc1_w"]
             .reshape(c_out, gh, gw, hidden)    # rows in PyTorch (c, h, w) order
             .transpose(1, 2, 0, 3)             # -> (h, w, c) row order
             .reshape(c_out * gh * gw, hidden)
             .astype(jnp.bfloat16))

    return {
        "conv_w": conv_w,
        "conv_b": b_eff.astype(jnp.float32),
        "fc1_w": fc1_w,
        "fc1_b": params["fc1_b"].astype(jnp.float32),
        "fc2_w": params["fc2_w"].astype(jnp.bfloat16),
        "fc2_b": params["fc2_b"].astype(jnp.float32),
    }


def yolo_forward(x, prep):
    B, _, H, W = x.shape
    c_out = prep["conv_w"].shape[1]

    # Conv2d(3x3, s=1, p=1, bias=False) + BN + LeakyReLU(0.1) as im2col GEMM.
    patches = _im2col_3x3(x.astype(jnp.bfloat16))                  # (B*H*W, Cin*9)
    y = gemm_bias_act(patches, prep["conv_w"], prep["conv_b"],
                      act="leaky_relu", out_dtype=jnp.bfloat16)    # (B*H*W, Cout)
    # Flatten in (b, h, w, c) order — pure reshape, no transpose; fc1_w rows
    # were permuted in prepare_params to match.
    y = y.reshape(B, H * W * c_out)

    # classifier: Linear -> ReLU -> Dropout -> Linear
    h = gemm_bias_act(y, prep["fc1_w"], prep["fc1_b"],
                      act="relu", out_dtype=jnp.bfloat16)
    # TODO(synk): nn.Dropout() is stochastic in training mode; implemented here
    # as eval-mode identity (training parity would need pltpu.prng_* masking).
    out = gemm_bias_act(h, prep["fc2_w"], prep["fc2_b"],
                        act="none", out_dtype=jnp.float32)
    return out


def yolo_reference(x, params):
    """Pure-JAX f32 reference with PyTorch semantics (NCHW flatten order)."""
    scale = params["bn_gamma"] / jnp.sqrt(params["bn_var"] + 1e-5)
    w_eff = params["conv_w"] * scale[:, None, None, None]
    b_eff = params["bn_beta"] - params["bn_mean"] * scale
    y = jax.lax.conv_general_dilated(
        x, w_eff, (1, 1), "SAME", dimension_numbers=("NCHW", "OIHW", "NCHW"))
    y = y + b_eff[None, :, None, None]
    y = jnp.where(y >= 0.0, y, 0.1 * y)
    y = y.reshape(x.shape[0], -1)
    h = jnp.maximum(y @ params["fc1_w"] + params["fc1_b"], 0.0)
    return h @ params["fc2_w"] + params["fc2_b"]


# --------------------------------- main ------------------------------------ #
if __name__ == "__main__":
    # Small stand-ins for the real 1024/256/4096 channel sizes; the structure
    # (3x3 conv-bn-leaky on a 7x7 grid, flatten, two linears with output
    # 7*7*(3*5+20)=1715) matches the module exactly.
    B, C_IN, C_MID = 2, 64, 32
    GH, GW = 7, 7
    HIDDEN = 128
    NUM_BOXES, NUM_CLASSES = 3, 20
    OUT = GH * GW * (NUM_BOXES * 5 + NUM_CLASSES)                  # 1715

    key = jax.random.PRNGKey(0)
    ks = jax.random.split(key, 10)
    x = jax.random.normal(ks[0], (B, C_IN, GH, GW), jnp.float32)
    params = {
        "conv_w": 0.05 * jax.random.normal(ks[1], (C_MID, C_IN, 3, 3), jnp.float32),
        "bn_gamma": 1.0 + 0.1 * jax.random.normal(ks[2], (C_MID,), jnp.float32),
        "bn_beta": 0.1 * jax.random.normal(ks[3], (C_MID,), jnp.float32),
        "bn_mean": 0.1 * jax.random.normal(ks[4], (C_MID,), jnp.float32),
        "bn_var": jnp.abs(jax.random.normal(ks[5], (C_MID,), jnp.float32)) + 0.5,
        "fc1_w": 0.02 * jax.random.normal(ks[6], (C_MID * GH * GW, HIDDEN), jnp.float32),
        "fc1_b": 0.01 * jax.random.normal(ks[7], (HIDDEN,), jnp.float32),
        "fc2_w": 0.02 * jax.random.normal(ks[8], (HIDDEN, OUT), jnp.float32),
        "fc2_b": 0.01 * jax.random.normal(ks[9], (OUT,), jnp.float32),
    }

    prep = prepare_params(params, (GH, GW))
    out = jax.jit(yolo_forward)(x, prep)
    jax.block_until_ready(out)
    assert out.shape == (B, OUT) and out.dtype == jnp.float32

    ref = yolo_reference(x, params)
    err = float(jnp.max(jnp.abs(out - ref)))
    assert err < 1e-1, f"max abs err {err}"   # loose: bf16 weight/act streaming
    print("KERNEL_OK")
</pallas_src>

<mosaic_0001>
module attributes {stable_mosaic.version = 11 : i64} {
  func.func @_gemm_bias_act_kernel(%arg0: i32, %arg1: i32, %arg2: i32, %arg3: memref<56x640xbf16, #tpu.memory_space<vmem>>, %arg4: memref<640x128xbf16, #tpu.memory_space<vmem>>, %arg5: memref<1x128xf32, #tpu.memory_space<vmem>>, %arg6: memref<56x128xbf16, #tpu.memory_space<vmem>>, %arg7: memref<56x128xf32, #tpu.memory_space<vmem>>) attributes {dimension_semantics = [#tpu.dimension_semantics<parallel>, #tpu.dimension_semantics<parallel>, #tpu.dimension_semantics<arbitrary>], iteration_bounds = array<i64: 2, 1, 1>, scalar_prefetch = 0 : i64, scratch_operands = 1 : i64, tpu.core_type = #tpu.core_type<tc>, window_params = [{transform_indices = @transform_0, window_bounds = array<i64: 56, 640>}, {transform_indices = @transform_1, window_bounds = array<i64: 640, 128>}, {transform_indices = @transform_2, window_bounds = array<i64: 1, 128>}, {transform_indices = @transform_3, window_bounds = array<i64: 56, 128>}]} {
    %c0_i32 = arith.constant 0 : i32
    %0 = arith.cmpi eq, %arg2, %c0_i32 : i32
    %1 = arith.extui %0 : i1 to i32
    %c0_i32_0 = arith.constant 0 : i32
    %2 = arith.cmpi ne, %1, %c0_i32_0 : i32
    scf.if %2 {
      %cst_10 = arith.constant 0.000000e+00 : f32
      %12 = vector.broadcast %cst_10 : f32 to vector<56x128xf32>
      %c0_11 = arith.constant 0 : index
      %c0_12 = arith.constant 0 : index
      %13 = vector.load %arg7[%c0_11, %c0_12] : memref<56x128xf32, #tpu.memory_space<vmem>>, vector<56x128xf32>
      tpu.vector_store %arg7[%c0_11, %c0_12], %12 {strides = array<i32>} : memref<56x128xf32, #tpu.memory_space<vmem>>, vector<56x128xf32>,
    } else {
    }
    %c0 = arith.constant 0 : index
    %c0_1 = arith.constant 0 : index
    %3 = vector.load %arg7[%c0, %c0_1] : memref<56x128xf32, #tpu.memory_space<vmem>>, vector<56x128xf32>
    %c0_2 = arith.constant 0 : index
    %c0_3 = arith.constant 0 : index
    %4 = vector.load %arg3[%c0_2, %c0_3] : memref<56x640xbf16, #tpu.memory_space<vmem>>, vector<56x640xbf16>
    %c0_4 = arith.constant 0 : index
    %c0_5 = arith.constant 0 : index
    %5 = vector.load %arg4[%c0_4, %c0_5] : memref<640x128xbf16, #tpu.memory_space<vmem>>, vector<640x128xbf16>
    %cst = arith.constant dense<0.000000e+00> : vector<56x128xf32>
    %6 = tpu.matmul %4, %5, %cst {dimension_numbers = #tpu.dot_dimension_numbers<[1], [0], [0], [1], [0, 0, 1, 1], [], []>} : vector<56x640xbf16>, vector<640x128xbf16>, vector<56x128xf32> -> vector<56x128xf32>
    %7 = arith.addf %3, %6 : vector<56x128xf32>
    %c0_6 = arith.constant 0 : index
    %c0_7 = arith.constant 0 : index
    %8 = vector.load %arg7[%c0_6, %c0_7] : memref<56x128xf32, #tpu.memory_space<vmem>>, vector<56x128xf32>
    tpu.vector_store %arg7[%c0_6, %c0_7], %7 {strides = array<i32>} : memref<56x128xf32, #tpu.memory_space<vmem>>, vector<56x128xf32>,
    %c0_i32_8 = arith.constant 0 : i32
    %9 = arith.cmpi eq, %arg2, %c0_i32_8 : i32
    %10 = arith.extui %9 : i1 to i32
    %c0_i32_9 = arith.constant 0 : i32
    %11 = arith.cmpi ne, %10, %c0_i32_9 : i32
    scf.if %11 {
      %c0_10 = arith.constant 0 : index
      %c0_11 = arith.constant 0 : index
      %12 = vector.load %arg7[%c0_10, %c0_11] : memref<56x128xf32, #tpu.memory_space<vmem>>, vector<56x128xf32>
      %c0_12 = arith.constant 0 : index
      %c0_13 = arith.constant 0 : index
      %13 = vector.load %arg5[%c0_12, %c0_13] : memref<1x128xf32, #tpu.memory_space<vmem>>, vector<1x128xf32>
      %14 = vector.broadcast %13 : vector<1x128xf32> to vector<56x128xf32>
      %15 = arith.addf %12, %14 : vector<56x128xf32>
      %cst_14 = arith.constant 0.000000e+00 : f32
      %16 = vector.broadcast %cst_14 : f32 to vector<56x128xf32>
      %17 = arith.cmpf oge, %15, %16 : vector<56x128xf32>
      %cst_15 = arith.constant 1.000000e-01 : f32
      %18 = vector.broadcast %cst_15 : f32 to vector<56x128xf32>
      %19 = arith.mulf %18, %15 : vector<56x128xf32>
      %20 = arith.select %17, %15, %19 : vector<56x128xi1>, vector<56x128xf32>
      %21 = arith.truncf %20 : vector<56x128xf32> to vector<56x128xbf16>
      %c0_16 = arith.constant 0 : index
      %c0_17 = arith.constant 0 : index
      %22 = vector.load %arg6[%c0_16, %c0_17] : memref<56x128xbf16, #tpu.memory_space<vmem>>, vector<56x128xbf16>
      tpu.vector_store %arg6[%c0_16, %c0_17], %21 {strides = array<i32>} : memref<56x128xbf16, #tpu.memory_space<vmem>>, vector<56x128xbf16>,
    } else {
    }
    return
  }
  func.func @transform_0(%arg0: i32, %arg1: i32, %arg2: i32) -> (i32, i32) {
    %c0_i32 = arith.constant 0 : i32
    return %arg0, %arg2 : i32, i32
  }
  func.func @transform_1(%arg0: i32, %arg1: i32, %arg2: i32) -> (i32, i32) {
    %c0_i32 = arith.constant 0 : i32
    return %arg2, %arg1 : i32, i32
  }
  func.func @transform_2(%arg0: i32, %arg1: i32, %arg2: i32) -> (i32, i32) {
    %c0_i32 = arith.constant 0 : i32
    %c0_i32_0 = arith.constant 0 : i32
    return %c0_i32, %arg1 : i32, i32
  }
  func.func @transform_3(%arg0: i32, %arg1: i32, %arg2: i32) -> (i32, i32) {
    %c0_i32 = arith.constant 0 : i32
    return %arg0, %arg1 : i32, i32
  }
}

module attributes {stable_mosaic.version = 11 : i64} {
  func.func @_gemm_bias_act_kernel(%arg0: i32, %arg1: i32, %arg2: i32, %arg3: memref<8x1024xbf16, #tpu.memory_space<vmem>>, %arg4: memref<1024x128xbf16, #tpu.memory_space<vmem>>, %arg5: memref<1x128xf32, #tpu.memory_space<vmem>>, %arg6: memref<8x128xbf16, #tpu.memory_space<vmem>>, %arg7: memref<8x128xf32, #tpu.memory_space<vmem>>) attributes {dimension_semantics = [#tpu.dimension_semantics<parallel>, #tpu.dimension_semantics<parallel>, #tpu.dimension_semantics<arbitrary>], iteration_bounds = array<i64: 1, 1, 2>, scalar_prefetch = 0 : i64, scratch_operands = 1 : i64, tpu.core_type = #tpu.core_type<tc>, window_params = [{transform_indices = @transform_0, window_bounds = array<i64: 8, 1024>}, {transform_indices = @transform_1, window_bounds = array<i64: 1024, 128>}, {transform_indices = @transform_2, window_bounds = array<i64: 1, 128>}, {transform_indices = @transform_3, window_bounds = array<i64: 8, 128>}]} {
    %c0_i32 = arith.constant 0 : i32
    %0 = arith.cmpi eq, %arg2, %c0_i32 : i32
    %1 = arith.extui %0 : i1 to i32
    %c0_i32_0 = arith.constant 0 : i32
    %2 = arith.cmpi ne, %1, %c0_i32_0 : i32
    scf.if %2 {
      %cst_9 = arith.constant 0.000000e+00 : f32
      %12 = vector.broadcast %cst_9 : f32 to vector<8x128xf32>
      %c0_10 = arith.constant 0 : index
      %c0_11 = arith.constant 0 : index
      %13 = vector.load %arg7[%c0_10, %c0_11] : memref<8x128xf32, #tpu.memory_space<vmem>>, vector<8x128xf32>
      tpu.vector_store %arg7[%c0_10, %c0_11], %12 {strides = array<i32>} : memref<8x128xf32, #tpu.memory_space<vmem>>, vector<8x128xf32>,
    } else {
    }
    %c0 = arith.constant 0 : index
    %c0_1 = arith.constant 0 : index
    %3 = vector.load %arg7[%c0, %c0_1] : memref<8x128xf32, #tpu.memory_space<vmem>>, vector<8x128xf32>
    %c0_2 = arith.constant 0 : index
    %c0_3 = arith.constant 0 : index
    %4 = vector.load %arg3[%c0_2, %c0_3] : memref<8x1024xbf16, #tpu.memory_space<vmem>>, vector<8x1024xbf16>
    %c0_4 = arith.constant 0 : index
    %c0_5 = arith.constant 0 : index
    %5 = vector.load %arg4[%c0_4, %c0_5] : memref<1024x128xbf16, #tpu.memory_space<vmem>>, vector<1024x128xbf16>
    %cst = arith.constant dense<0.000000e+00> : vector<8x128xf32>
    %6 = tpu.matmul %4, %5, %cst {dimension_numbers = #tpu.dot_dimension_numbers<[1], [0], [0], [1], [0, 0, 1, 1], [], []>} : vector<8x1024xbf16>, vector<1024x128xbf16>, vector<8x128xf32> -> vector<8x128xf32>
    %7 = arith.addf %3, %6 : vector<8x128xf32>
    %c0_6 = arith.constant 0 : index
    %c0_7 = arith.constant 0 : index
    %8 = vector.load %arg7[%c0_6, %c0_7] : memref<8x128xf32, #tpu.memory_space<vmem>>, vector<8x128xf32>
    tpu.vector_store %arg7[%c0_6, %c0_7], %7 {strides = array<i32>} : memref<8x128xf32, #tpu.memory_space<vmem>>, vector<8x128xf32>,
    %c1_i32 = arith.constant 1 : i32
    %9 = arith.cmpi eq, %arg2, %c1_i32 : i32
    %10 = arith.extui %9 : i1 to i32
    %c0_i32_8 = arith.constant 0 : i32
    %11 = arith.cmpi ne, %10, %c0_i32_8 : i32
    scf.if %11 {
      %c0_9 = arith.constant 0 : index
      %c0_10 = arith.constant 0 : index
      %12 = vector.load %arg7[%c0_9, %c0_10] : memref<8x128xf32, #tpu.memory_space<vmem>>, vector<8x128xf32>
      %c0_11 = arith.constant 0 : index
      %c0_12 = arith.constant 0 : index
      %13 = vector.load %arg5[%c0_11, %c0_12] : memref<1x128xf32, #tpu.memory_space<vmem>>, vector<1x128xf32>
      %14 = vector.broadcast %13 : vector<1x128xf32> to vector<8x128xf32>
      %15 = arith.addf %12, %14 : vector<8x128xf32>
      %cst_13 = arith.constant 0.000000e+00 : f32
      %16 = vector.broadcast %cst_13 : f32 to vector<8x128xf32>
      %17 = arith.maximumf %15, %16 : vector<8x128xf32>
      %18 = arith.truncf %17 : vector<8x128xf32> to vector<8x128xbf16>
      %c0_14 = arith.constant 0 : index
      %c0_15 = arith.constant 0 : index
      %19 = vector.load %arg6[%c0_14, %c0_15] : memref<8x128xbf16, #tpu.memory_space<vmem>>, vector<8x128xbf16>
      tpu.vector_store %arg6[%c0_14, %c0_15], %18 {strides = array<i32>} : memref<8x128xbf16, #tpu.memory_space<vmem>>, vector<8x128xbf16>,
    } else {
    }
    return
  }
  func.func @transform_0(%arg0: i32, %arg1: i32, %arg2: i32) -> (i32, i32) {
    %c0_i32 = arith.constant 0 : i32
    return %arg0, %arg2 : i32, i32
  }
  func.func @transform_1(%arg0: i32, %arg1: i32, %arg2: i32) -> (i32, i32) {
    %c0_i32 = arith.constant 0 : i32
    return %arg2, %arg1 : i32, i32
  }
  func.func @transform_2(%arg0: i32, %arg1: i32, %arg2: i32) -> (i32, i32) {
    %c0_i32 = arith.constant 0 : i32
    %c0_i32_0 = arith.constant 0 : i32
    return %c0_i32, %arg1 : i32, i32
  }
  func.func @transform_3(%arg0: i32, %arg1: i32, %arg2: i32) -> (i32, i32) {
    %c0_i32 = arith.constant 0 : i32
    return %arg0, %arg1 : i32, i32
  }
}

module attributes {stable_mosaic.version = 11 : i64} {
  func.func @_gemm_bias_act_kernel(%arg0: i32, %arg1: i32, %arg2: i32, %arg3: memref<8x128xbf16, #tpu.memory_space<vmem>>, %arg4: memref<128x256xbf16, #tpu.memory_space<vmem>>, %arg5: memref<1x256xf32, #tpu.memory_space<vmem>>, %arg6: memref<8x256xf32, #tpu.memory_space<vmem>>, %arg7: memref<8x256xf32, #tpu.memory_space<vmem>>) attributes {dimension_semantics = [#tpu.dimension_semantics<parallel>, #tpu.dimension_semantics<parallel>, #tpu.dimension_semantics<arbitrary>], iteration_bounds = array<i64: 1, 7, 1>, scalar_prefetch = 0 : i64, scratch_operands = 1 : i64, tpu.core_type = #tpu.core_type<tc>, window_params = [{transform_indices = @transform_0, window_bounds = array<i64: 8, 128>}, {transform_indices = @transform_1, window_bounds = array<i64: 128, 256>}, {transform_indices = @transform_2, window_bounds = array<i64: 1, 256>}, {transform_indices = @transform_3, window_bounds = array<i64: 8, 256>}]} {
    %c0_i32 = arith.constant 0 : i32
    %0 = arith.cmpi eq, %arg2, %c0_i32 : i32
    %1 = arith.extui %0 : i1 to i32
    %c0_i32_0 = arith.constant 0 : i32
    %2 = arith.cmpi ne, %1, %c0_i32_0 : i32
    scf.if %2 {
      %cst_10 = arith.constant 0.000000e+00 : f32
      %12 = vector.broadcast %cst_10 : f32 to vector<8x256xf32>
      %c0_11 = arith.constant 0 : index
      %c0_12 = arith.constant 0 : index
      %13 = vector.load %arg7[%c0_11, %c0_12] : memref<8x256xf32, #tpu.memory_space<vmem>>, vector<8x256xf32>
      tpu.vector_store %arg7[%c0_11, %c0_12], %12 {strides = array<i32>} : memref<8x256xf32, #tpu.memory_space<vmem>>, vector<8x256xf32>,
    } else {
    }
    %c0 = arith.constant 0 : index
    %c0_1 = arith.constant 0 : index
    %3 = vector.load %arg7[%c0, %c0_1] : memref<8x256xf32, #tpu.memory_space<vmem>>, vector<8x256xf32>
    %c0_2 = arith.constant 0 : index
    %c0_3 = arith.constant 0 : index
    %4 = vector.load %arg3[%c0_2, %c0_3] : memref<8x128xbf16, #tpu.memory_space<vmem>>, vector<8x128xbf16>
    %c0_4 = arith.constant 0 : index
    %c0_5 = arith.constant 0 : index
    %5 = vector.load %arg4[%c0_4, %c0_5] : memref<128x256xbf16, #tpu.memory_space<vmem>>, vector<128x256xbf16>
    %cst = arith.constant dense<0.000000e+00> : vector<8x256xf32>
    %6 = tpu.matmul %4, %5, %cst {dimension_numbers = #tpu.dot_dimension_numbers<[1], [0], [0], [1], [0, 0, 1, 1], [], []>} : vector<8x128xbf16>, vector<128x256xbf16>, vector<8x256xf32> -> vector<8x256xf32>
    %7 = arith.addf %3, %6 : vector<8x256xf32>
    %c0_6 = arith.constant 0 : index
    %c0_7 = arith.constant 0 : index
    %8 = vector.load %arg7[%c0_6, %c0_7] : memref<8x256xf32, #tpu.memory_space<vmem>>, vector<8x256xf32>
    tpu.vector_store %arg7[%c0_6, %c0_7], %7 {strides = array<i32>} : memref<8x256xf32, #tpu.memory_space<vmem>>, vector<8x256xf32>,
    %c0_i32_8 = arith.constant 0 : i32
    %9 = arith.cmpi eq, %arg2, %c0_i32_8 : i32
    %10 = arith.extui %9 : i1 to i32
    %c0_i32_9 = arith.constant 0 : i32
    %11 = arith.cmpi ne, %10, %c0_i32_9 : i32
    scf.if %11 {
      %c0_10 = arith.constant 0 : index
      %c0_11 = arith.constant 0 : index
      %12 = vector.load %arg7[%c0_10, %c0_11] : memref<8x256xf32, #tpu.memory_space<vmem>>, vector<8x256xf32>
      %c0_12 = arith.constant 0 : index
      %c0_13 = arith.constant 0 : index
      %13 = vector.load %arg5[%c0_12, %c0_13] : memref<1x256xf32, #tpu.memory_space<vmem>>, vector<1x256xf32>
      %14 = vector.broadcast %13 : vector<1x256xf32> to vector<8x256xf32>
      %15 = arith.addf %12, %14 : vector<8x256xf32>
      %c0_14 = arith.constant 0 : index
      %c0_15 = arith.constant 0 : index
      %16 = vector.load %arg6[%c0_14, %c0_15] : memref<8x256xf32, #tpu.memory_space<vmem>>, vector<8x256xf32>
      tpu.vector_store %arg6[%c0_14, %c0_15], %15 {strides = array<i32>} : memref<8x256xf32, #tpu.memory_space<vmem>>, vector<8x256xf32>,
    } else {
    }
    return
  }
  func.func @transform_0(%arg0: i32, %arg1: i32, %arg2: i32) -> (i32, i32) {
    %c0_i32 = arith.constant 0 : i32
    return %arg0, %arg2 : i32, i32
  }
  func.func @transform_1(%arg0: i32, %arg1: i32, %arg2: i32) -> (i32, i32) {
    %c0_i32 = arith.constant 0 : i32
    return %arg2, %arg1 : i32, i32
  }
  func.func @transform_2(%arg0: i32, %arg1: i32, %arg2: i32) -> (i32, i32) {
    %c0_i32 = arith.constant 0 : i32
    %c0_i32_0 = arith.constant 0 : i32
    return %c0_i32, %arg1 : i32, i32
  }
  func.func @transform_3(%arg0: i32, %arg1: i32, %arg2: i32) -> (i32, i32) {
    %c0_i32 = arith.constant 0 : i32
    return %arg0, %arg1 : i32, i32
  }
}

</mosaic_0001>

<bundles_post_ra>
// kernel: yolo_forward.3
= control target key start
LH: loop header
LB: loop body
LE: loop exit
PB: predicated region body
PF: predicated region fallthrough
CT: control target
= control target key end

     0   :  { %s1494_s12 = smov 0   ;;  %s1496_s13 = smov 0   ;;  %s1677_s0 = inlined_call_operand.vmem [shape: bf16[112,640], index: 0, kind: input, shape index: {}]   ;;  %s1678_s1 = inlined_call_operand.vmem [shape: bf16[640,128], index: 1, kind: input, shape index: {}]   ;;  %s1679_s2 = inlined_call_operand.vmem [shape: f32[1,128], index: 2, kind: input, shape index: {}]   ;;  %s1680_s3 = inlined_call_operand.vmem [shape: bf16[112,128], index: 3, kind: output, shape index: {}]  }
   0x1   :  { %s1498_s14 = smov 0  }
   0x2 LB: > { %s32_s15 = sadd.s32 1, %s1468_s13  ;;  %p1130_p0 = scmp.ge.s32.totalorder %s1472_s14, 1  ;;  %s1472_s14 = sphi %s1498_s14, %s13_s14   ;;  %s1468_s13 = sphi %s1496_s13, %s1682_s13   ;;  %s1464_s12 = sphi %s1494_s12, %s1681_s12  }
   0x3   : > { %p34_p1 = scmp.ge.s32.totalorder %s32_s15, 2  ;;  %p191_p2 = scmp.lt.s32.totalorder %s1472_s14, 3 }
   0x5   : > { %s1684_s15 = smov (%p34_p1, %s32_s15), 0  ;;  %p192_p3 = pnand %p1130_p0, %p191_p2 }
   0x6   : > { %v1384_v0 = vld [vmem:[%s1678_s1 + $0x40] sm:$0xff] (!%p192_p3)   ;;  %v1388_v4 = vld [vmem:[%s1678_s1 + $0x48] sm:$0xff] (!%p192_p3)   ;;  %v1392_v8 = vld [vmem:[%s1678_s1 + $0x50] sm:$0xff] (!%p192_p3)   ;;  %s234_s21 = smul.u32 (!%p192_p3), 7, %s1464_s12 }
   0x7   : > { %195 = sbr.rel (%p192_p3) target bundleno = 301 (0x12d), region = 32  ;;  %v1385_v1 = vld [vmem:[%s1678_s1 + $0xc0] sm:$0xff] (!%p192_p3)   ;;  %1227 = vmatprep.subr.bf16.mxu0 (!%p192_p3), %v1384_v0  ;;  %v1389_v5 = vld [vmem:[%s1678_s1 + $0xc8] sm:$0xff] (!%p192_p3)   ;;  %v1393_v9 = vld [vmem:[%s1678_s1 + $0xd0] sm:$0xff] (!%p192_p3)  }
   0x8   : > { %v1386_v2 = vld [vmem:[%s1678_s1] sm:$0xff] (!%p192_p3)   ;;  %1267 = vmatprep.subr.bf16.mxu1 (!%p192_p3), %v1385_v1  ;;  %v1390_v6 = vld [vmem:[%s1678_s1 + $0x8] sm:$0xff] (!%p192_p3)   ;;  %v1394_v10 = vld [vmem:[%s1678_s1 + $0x10] sm:$0xff] (!%p192_p3)   ;;  %p236_p4 = scmp.lt.s32.totalorder (!%p192_p3), %s234_s21, 13 }
   0x9   : > { %v1387_v3 = vld [vmem:[%s1678_s1 + $0x80] sm:$0xff] (!%p192_p3)   ;;  %1228 = vmatpush3.bf16.msra.mxu0 (!%p192_p3), %v1386_v2  ;;  %v1391_v7 = vld [vmem:[%s1678_s1 + $0x88] sm:$0xff] (!%p192_p3)   ;;  %v1395_v11 = vld [vmem:[%s1678_s1 + $0x90] sm:$0xff] (!%p192_p3)  }
   0xa   : > { %1268 = vmatpush3.bf16.msra.mxu1 (!%p192_p3), %v1387_v3  ;;  %1229 = vmatprep.subr.bf16.mxu0 (!%p192_p3), %v1388_v4  ;;  %v1396_v12 = vld [vmem:[%s1678_s1 + $0x58] sm:$0xff] (!%p192_p3)   ;;  %v1400_v16 = vld [vmem:[%s1678_s1 + $0x60] sm:$0xff] (!%p192_p3)   ;;  %v1404_v20 = vld [vmem:[%s1678_s1 + $0x68] sm:$0xff] (!%p192_p3)  }
   0xb   : > { %1269 = vmatprep.subr.bf16.mxu1 (!%p192_p3), %v1389_v5  ;;  %v1397_v13 = vld [vmem:[%s1678_s1 + $0xd8] sm:$0xff] (!%p192_p3)   ;;  %v1401_v17 = vld [vmem:[%s1678_s1 + $0xe0] sm:$0xff] (!%p192_p3)   ;;  %v1405_v21 = vld [vmem:[%s1678_s1 + $0xe8] sm:$0xff] (!%p192_p3)  }
   0xc   : > { %v1398_v14 = vld [vmem:[%s1678_s1 + $0x18] sm:$0xff] (!%p192_p3)   ;;  %v1402_v18 = vld [vmem:[%s1678_s1 + $0x20] sm:$0xff] (!%p192_p3)   ;;  %v1406_v22 = vld [vmem:[%s1678_s1 + $0x28] sm:$0xff] (!%p192_p3)  }
   0xd   : > { %1230 = vmatpush3.bf16.msra.mxu0 (!%p192_p3), %v1390_v6  ;;  %v1399_v15 = vld [vmem:[%s1678_s1 + $0x98] sm:$0xff] (!%p192_p3)   ;;  %v1403_v19 = vld [vmem:[%s1678_s1 + $0xa0] sm:$0xff] (!%p192_p3)   ;;  %v1407_v23 = vld [vmem:[%s1678_s1 + $0xa8] sm:$0xff] (!%p192_p3)  }
   0xe   : > { %1270 = vmatpush3.bf16.msra.mxu1 %v1391_v7  ;;  %1231 = vmatprep.subr.bf16.mxu0 %v1392_v8  ;;  %s1686_s21 = smov (!%p236_p4, %s234_s21), 13  ;;  %v1408_v24 = vld [vmem:[%s1678_s1 + $0x70] sm:$0xff]   ;;  %v1412_v28 = vld [vmem:[%s1678_s1 + $0x78] sm:$0xff]   ;;  %v1422_v36 = vld [vmem:[%s1678_s1 + $0x100] sm:$0xff]  }
   0xf   : > { %1271 = vmatprep.subr.bf16.mxu1 %v1393_v9  ;;  %v1409_v25 = vld [vmem:[%s1678_s1 + $0xf0] sm:$0xff]   ;;  %s1359_s23 = smul.u32 20, %s1686_s21  ;;  %v1413_v29 = vld [vmem:[%s1678_s1 + $0xf8] sm:$0xff]   ;;  %v1423_v37 = vld [vmem:[%s1678_s1 + $0x108] sm:$0xff]  }
  0x10   : > { %v1410_v26 = vld [vmem:[%s1678_s1 + $0x30] sm:$0xff]   ;;  %v1414_v30 = vld [vmem:[%s1678_s1 + $0x38] sm:$0xff]   ;;  %v1438_v46 = vld [vmem:[%s1678_s1 + $0x120] sm:$0xff]  }
  0x11   : > { %1232 = vmatpush3.bf16.msra.mxu0 %v1394_v10  ;;  %v1411_v27 = vld [vmem:[%s1678_s1 + $0xb0] sm:$0xff]   ;;  %s1611_s6 = scalar_lea.vmem %s1677_s0, %s1359_s23  ;;  %v1415_v31 = vld [vmem:[%s1678_s1 + $0xb8] sm:$0xff]   ;;  %v1439_v53 = vld [vmem:[%s1678_s1 + $0x128] sm:$0xff]  }
  0x12   : > { %1272 = vmatpush3.bf16.msra.mxu1 %v1395_v11  ;;  %1233 = vmatprep.subr.bf16.mxu0 %v1396_v12  ;;  %v1416_v32 = vld [vmem:[%s1611_s6] ss:$20 sps:$4 sm:$0xff]   ;;  %v1418_v33 = vld [vmem:[%s1611_s6 + $0x4] ss:$20 sps:$4 sm:$0xff]   ;;  %v1419_v34 = vld [vmem:[%s1611_s6 + $0x8] ss:$20 sps:$4 sm:$0xff]  }
  0x13   : > { %1273 = vmatprep.subr.bf16.mxu1 %v1397_v13  ;;  %v1421_v35 = vld [vmem:[%s1611_s6 + $0xc] ss:$20 sps:$4 sm:$0xff]   ;;  %755 = vmatprep.mubr.bf16.mxu0 %v1418_v33  ;;  %v1426_v39 = vld [vmem:[%s1611_s6 + $0x34] ss:$20 sps:$4 sm:$0xff]   ;;  %v1429_v42 = vld [vmem:[%s1611_s6 + $0x30] ss:$20 sps:$4 sm:$0xff]  }
  0x14   : > { %819 = vmatprep.mubr.bf16.mxu1 %v1421_v35  ;;  %v1424_v38 = vld [vmem:[%s1611_s6 + $0x2c] ss:$20 sps:$4 sm:$0xff]   ;;  %v1428_v40 = vld [vmem:[%s1611_s6 + $0x28] ss:$20 sps:$4 sm:$0xff]   ;;  %v1430_v41 = vld [vmem:[%s1678_s1 + $0x110] sm:$0xff]  }
  0x15   : > { %1234 = vmatpush3.bf16.msra.mxu0 %v1398_v14  ;;  %v1432_v43 = vld [vmem:[%s1611_s6 + $0x54] ss:$20 sps:$4 sm:$0xff]   ;;  %v1431_v44 = vld [vmem:[%s1678_s1 + $0x118] sm:$0xff]   ;;  %v305_v48 = vld [vmem:[%s1611_s6 + $0x80] sm:$0xff] }
  0x16   : > { %1274 = vmatpush3.bf16.msra.mxu1 %v1399_v15  ;;  %1235 = vmatprep.subr.bf16.mxu0 %v1400_v16  ;;  %v1434_v45 = vld [vmem:[%s1611_s6 + $0x5c] ss:$20 sps:$4 sm:$0xff]   ;;  %v1437_v50 = vld [vmem:[%s1611_s6 + $0x58] ss:$20 sps:$4 sm:$0xff]   ;;  %v1151_v52 = vcombine.high %v305_v48, %v305_v48  ;;  %v1150_v56 = vcombine.low %v305_v48, %v305_v48  ;;  %v1447_v58 = vld [vmem:[%s1611_s6 + $0x60] ss:$20 sps:$4 sm:$0xff]  }
  0x17   : > { %1275 = vmatprep.subr.bf16.mxu1 %v1401_v17  ;;  %v304_v47 = vld [vmem:[%s1611_s6 + $0x78] sm:$0xff]  ;;  %v1436_v49 = vld [vmem:[%s1611_s6 + $0x50] ss:$20 sps:$4 sm:$0xff]   ;;  %v1449_v61 = vld [vmem:[%s1611_s6 + $0x88] ss:$0 sps:$4 sm:$0xff]  }
  0x18   : > { %v1149_v51 = vcombine.high %v304_v47, %v304_v47  ;;  %v1444_v54 = vld [vmem:[%s1678_s1 + $0x130] sm:$0xff]   ;;  %v1148_v55 = vcombine.low %v304_v47, %v304_v47  ;;  %v1445_v59 = vld [vmem:[%s1678_s1 + $0x138] sm:$0xff]  }
  0x19   : > { %1236 = vmatpush3.bf16.msra.mxu0 %v1402_v18  ;;  %v1446_v57 = vld [vmem:[%s1611_s6 + $0x10] ss:$20 sps:$4 sm:$0xff]   ;;  %v1448_v60 = vld [vmem:[%s1611_s6 + $0x38] ss:$20 sps:$4 sm:$0xff]   ;;  %s1132_s6 = sshll.u32 %s1686_s21, 2 }
  0x1a   : > { %1276 = vmatpush3.bf16.msra.mxu1 %v1403_v19  ;;  %1237 = vmatprep.subr.bf16.mxu0 %v1404_v20  ;;  %s265_s9 = scalar_lea.vmem %s1680_s3, %s1132_s6 }
  0x1b   : > { %1277 = vmatprep.subr.bf16.mxu1 %v1405_v21 }
  0x1d   : > { %1238 = vmatpush3.bf16.msra.mxu0 %v1406_v22 }
  0x1e   : > { %1278 = vmatpush3.bf16.msra.mxu1 %v1407_v23  ;;  %1239 = vmatprep.subr.bf16.mxu0 %v1408_v24 }
  0x1f   : > { %1279 = vmatprep.subr.bf16.mxu1 %v1409_v25 }
  0x21   : > { %1240 = vmatpush3.bf16.msra.mxu0 %v1410_v26 }
  0x22   : > { %1280 = vmatpush3.bf16.msra.mxu1 %v1411_v27  ;;  %1241 = vmatprep.subr.bf16.mxu0 %v1412_v28 }
  0x23   : > { %1281 = vmatprep.subr.bf16.mxu1 %v1413_v29 }
  0x25   : > { %1242 = vmatpush3.bf16.msra.mxu0 %v1414_v30 }
  0x26   : > { %1282 = vmatpush3.bf16.msra.mxu1 %v1415_v31  ;;  %1319 = vmatprep.subr.bf16.mxu0 %v1422_v36 }
  0x27   : > { %1343 = vmatprep.subr.bf16.mxu1 %v1422_v36 }
  0x28   : > { %756 = vmatmul.mubr.bf16.vlgmr.msra.gmra.mrb[0].mxu0 %v1416_v32 }
  0x29   : > { %820 = vmatmul.mubr.bf16.vlgmr.msra.gmra.mrb[0].mxu1 %v1419_v34  ;;  %1320 = vmatpush3.bf16.msra.mxu0 %v1422_v36 }
  0x2a   : > { %1351 = vmatpush3.bf16.msra.mxu1 %v1422_v36  ;;  %1321 = vmatprep.subr.bf16.mxu0 %v1423_v37 }
  0x2b   : > { %1344 = vmatprep.subr.bf16.mxu1 %v1423_v37  ;;  %763 = vmatprep.mubr.bf16.mxu0 %v1424_v38 }
  0x2c   : > { %827 = vmatprep.mubr.bf16.mxu1 %v1426_v39 }
  0x2d   : > { %1322 = vmatpush3.bf16.msra.mxu0 %v1423_v37 }
  0x2e   : > { %1352 = vmatpush3.bf16.msra.mxu1 %v1423_v37  ;;  %1323 = vmatprep.subr.bf16.mxu0 %v1430_v41 }
  0x2f   : > { %1345 = vmatprep.subr.bf16.mxu1 %v1430_v41 }
  0x30   : > { %764 = vmatmul.mubr.bf16.gmra.mrb[4].mxu0 %v1428_v40 }
  0x31   : > { %828 = vmatmul.mubr.bf16.gmra.mrb[4].mxu1 %v1429_v42  ;;  %771 = vmatprep.mubr.bf16.mxu0 %v1432_v43 }
  0x32   : > { %1324 = vmatpush3.bf16.msra.mxu0 %v1430_v41  ;;  %835 = vmatprep.mubr.bf16.mxu1 %v1434_v45 }
  0x33   : > { %1353 = vmatpush3.bf16.msra.mxu1 %v1430_v41  ;;  %1325 = vmatprep.subr.bf16.mxu0 %v1431_v44 }
  0x34   : > { %1346 = vmatprep.subr.bf16.mxu1 %v1431_v44 }
  0x36   : > { %1326 = vmatpush3.bf16.msra.mxu0 %v1431_v44 }
  0x37   : > { %1354 = vmatpush3.bf16.msra.mxu1 %v1431_v44  ;;  %1327 = vmatprep.subr.bf16.mxu0 %v1438_v46 }
  0x38   : > { %772 = vmatmul.mubr.bf16.gmra.mrb[8].mxu0 %v1436_v49  ;;  %1347 = vmatprep.subr.bf16.mxu1 %v1438_v46 }
  0x39   : > { %836 = vmatmul.mubr.bf16.gmra.mrb[8].mxu1 %v1437_v50  ;;  %779 = vmatprep.mubr.bf16.mxu0 %v1149_v51 }
  0x3a   : > { %1328 = vmatpush3.bf16.msra.mxu0 %v1438_v46  ;;  %843 = vmatprep.mubr.bf16.mxu1 %v1151_v52  ;;  %v1193_v52 = vld [vmem:[%s1679_s2] ss:$0 sm:$0xff] }
  0x3b   : > { %1355 = vmatpush3.bf16.msra.mxu1 %v1438_v46  ;;  %1329 = vmatprep.subr.bf16.mxu0 %v1439_v53 }
  0x3c   : > { %1348 = vmatprep.subr.bf16.mxu1 %v1439_v53 }
  0x3e   : > { %1330 = vmatpush3.bf16.msra.mxu0 %v1439_v53 }
  0x3f   : > { %1356 = vmatpush3.bf16.msra.mxu1 %v1439_v53  ;;  %1331 = vmatprep.subr.bf16.mxu0 %v1444_v54 }
  0x40   : > { %780 = vmatmul.mubr.bf16.gmra.mrb[12].mxu0 %v1148_v55  ;;  %1349 = vmatprep.subr.bf16.mxu1 %v1444_v54 }
  0x41   : > { %844 = vmatmul.mubr.bf16.gmra.mrb[12].mxu1 %v1150_v56  ;;  %1335 = vmatprep.mubr.bf16.mxu0 %v1446_v57 }
  0x42   : > { %1332 = vmatpush3.bf16.msra.mxu0 %v1444_v54  ;;  %1339 = vmatprep.mubr.bf16.mxu1 %v1447_v58 }
  0x43   : > { %1357 = vmatpush3.bf16.msra.mxu1 %v1444_v54  ;;  %1333 = vmatprep.subr.bf16.mxu0 %v1445_v59 }
  0x44   : > { %1350 = vmatprep.subr.bf16.mxu1 %v1445_v59 }
  0x46   : > { %1334 = vmatpush3.bf16.msra.mxu0 %v1445_v59 }
  0x47   : > { %1358 = vmatpush3.bf16.msra.mxu1 %v1445_v59 }
  0x49   : > { %1336 = vmatmul.mubr.bf16.vlgmr.msra.gmra.mrb[16].mxu0 %v1448_v60 }
  0x4a   : > { %1340 = vmatmul.mubr.bf16.vlgmr.msra.gmra.mrb[16].mxu1 %v1449_v61 }
  0xfb   : > { %v1243_v62 = vpop.f32.mrb[0].mxu0 }
  0xfc   : > { %v1283_v63 = vpop.f32.mrb[0].mxu1  ;;  %v1244_v0 = vpop.f32.mrb[1].mxu0 }
  0xfd   : > { %v1245_v1 = vadd.f32 %v1244_v0, %v1243_v62  ;;  %v1284_v2 = vpop.f32.mrb[1].mxu1  ;;  %v1246_v3 = vpop.f32.mrb[2].mxu0 }
  0xfe   : > { %v1285_v4 = vadd.f32 %v1284_v2, %v1283_v63  ;;  %v1286_v5 = vpop.f32.mrb[2].mxu1  ;;  %v1247_v6 = vpop.f32.mrb[3].mxu0 }
  0xff   : > { %v1248_v7 = vadd.f32 %v1247_v6, %v1246_v3  ;;  %v1287_v8 = vpop.f32.mrb[3].mxu1 }
 0x100   : > { %v1288_v9 = vadd.f32 %v1287_v8, %v1286_v5  ;;  %v822_v10 = vadd.f32 %v1285_v4, %v1245_v1 }
 0x102   : > { %v825_v11 = vadd.f32 %v1288_v9, %v1248_v7 }
 0x103   : > { %v1249_v12 = vpop.f32.mrb[4].mxu0 }
 0x104   : > { %v1289_v13 = vpop.f32.mrb[4].mxu1  ;;  %v1250_v14 = vpop.f32.mrb[5].mxu0 }
 0x105   : > { %v1251_v15 = vadd.f32 %v1250_v14, %v1249_v12  ;;  %v1290_v16 = vpop.f32.mrb[5].mxu1  ;;  %v1252_v17 = vpop.f32.mrb[6].mxu0 }
 0x106   : > { %v1291_v18 = vadd.f32 %v1290_v16, %v1289_v13  ;;  %v1292_v19 = vpop.f32.mrb[6].mxu1  ;;  %v1253_v20 = vpop.f32.mrb[7].mxu0 }
 0x107   : > { %v1254_v21 = vadd.f32 %v1253_v20, %v1252_v17  ;;  %v1293_v22 = vpop.f32.mrb[7].mxu1 }
 0x108   : > { %v1294_v23 = vadd.f32 %v1293_v22, %v1292_v19  ;;  %v830_v24 = vadd.f32 %v1291_v18, %v1251_v15 }
 0x10a   : > { %v833_v25 = vadd.f32 %v1294_v23, %v1254_v21 }
 0x10b   : > { %v1255_v26 = vpop.f32.mrb[8].mxu0 }
 0x10c   : > { %v1295_v27 = vpop.f32.mrb[8].mxu1  ;;  %v1256_v28 = vpop.f32.mrb[9].mxu0 }
 0x10d   : > { %v1257_v29 = vadd.f32 %v1256_v28, %v1255_v26  ;;  %v1296_v30 = vpop.f32.mrb[9].mxu1  ;;  %v1258_v31 = vpop.f32.mrb[10].mxu0 }
 0x10e   : > { %v1297_v32 = vadd.f32 %v1296_v30, %v1295_v27  ;;  %v1298_v33 = vpop.f32.mrb[10].mxu1  ;;  %v1259_v34 = vpop.f32.mrb[11].mxu0 }
 0x10f   : > { %v1260_v35 = vadd.f32 %v1259_v34, %v1258_v31  ;;  %v1299_v36 = vpop.f32.mrb[11].mxu1 }
 0x110   : > { %v1300_v37 = vadd.f32 %v1299_v36, %v1298_v33  ;;  %v838_v38 = vadd.f32 %v1297_v32, %v1257_v29 }
 0x112   : > { %v841_v39 = vadd.f32 %v1300_v37, %v1260_v35 }
 0x113   : > { %v1261_v40 = vpop.f32.mrb[12].mxu0 }
 0x114   : > { %v1301_v41 = vpop.f32.mrb[12].mxu1  ;;  %v1262_v42 = vpop.f32.mrb[13].mxu0 }
 0x115   : > { %v1263_v43 = vadd.f32 %v1262_v42, %v1261_v40  ;;  %v1302_v44 = vpop.f32.mrb[13].mxu1  ;;  %v1264_v45 = vpop.f32.mrb[14].mxu0 }
 0x116   : > { %v1303_v46 = vadd.f32 %v1302_v44, %v1301_v41  ;;  %v1304_v47 = vpop.f32.mrb[14].mxu1  ;;  %v1265_v48 = vpop.f32.mrb[15].mxu0 }
 0x117   : > { %v1305_v49 = vpop.f32.mrb[15].mxu1 }
 0x118   : > { %v846_v50 = vadd.f32 %v1303_v46, %v1263_v43 }
 0x11c   : > { %v1337_v51 = vpop.f32.mrb[16].mxu0 }
 0x11d   : > { %v894_v53 = vadd.f32 %v1337_v51, %v830_v24  ;;  %v1341_v54 = vpop.f32.mrb[16].mxu1  ;;  %v885_v55 = vpop.f32.mrb[17].mxu0 }
 0x11e   : > { %v910_v56 = vadd.f32 %v1341_v54, %v846_v50  ;;  %v886_v57 = vadd.f32 %v885_v55, %v822_v10  ;;  %v901_v58 = vpop.f32.mrb[17].mxu1  ;;  %v1338_v59 = vpop.f32.mrb[18].mxu0 }
 0x11f   : > { %v948_v60 = vadd.f32 %v1193_v52, %v894_v53  ;;  %v902_v61 = vadd.f32 %v901_v58, %v838_v38  ;;  %v897_v62 = vadd.f32 %v1338_v59, %v833_v25  ;;  %v1342_v63 = vpop.f32.mrb[18].mxu1  ;;  %v888_v0 = vpop.f32.mrb[19].mxu0 }
 0x120   : > { %v952_v1 = vadd.f32 %v1193_v52, %v910_v56  ;;  %v946_v2 = vadd.f32 %v1193_v52, %v886_v57  ;;  %v889_v3 = vadd.f32 %v888_v0, %v825_v11  ;;  %v904_v4 = vpop.f32.mrb[19].mxu1 }
 0x121   : > { %v949_v5 = vadd.f32 %v1193_v52, %v897_v62  ;;  %v962_v6 = vmul.f32 0.1, %v948_v60  ;;  %vm955_vm1 = vcmp.ge.f32.partialorder %v948_v60, 0.0  ;;  %v950_v8 = vadd.f32 %v1193_v52, %v902_v61 }
 0x122   : > { %vm959_vm0 = vcmp.ge.f32.partialorder %v952_v1, 0.0  ;;  %v966_v7 = vmul.f32 0.1, %v952_v1  ;;  %v960_v10 = vmul.f32 0.1, %v946_v2  ;;  %v947_v13 = vadd.f32 %v1193_v52, %v889_v3 }
 0x123   : > { %vm956_vm2 = vcmp.ge.f32.partialorder %v949_v5, 0.0  ;;  %v963_v12 = vmul.f32 0.1, %v949_v5  ;;  %vm953_vm3 = vcmp.ge.f32.partialorder %v946_v2, 0.0  ;;  %v905_v11 = vadd.f32 %v904_v4, %v841_v39 }
 0x124   : > { %v973_v9 = vsel %vm959_vm0, %v952_v1, %v966_v7  ;;  %v969_v15 = vsel %vm955_vm1, %v948_v60, %v962_v6  ;;  %vm954_vm4 = vcmp.ge.f32.partialorder %v947_v13, 0.0  ;;  %v961_v17 = vmul.f32 0.1, %v947_v13 }
 0x125   : > { %v1209_v14 = vpack.c.bf16 %v973_v9, %v973_v9  ;;  %v970_v16 = vsel %vm956_vm2, %v949_v5, %v963_v12  ;;  %v964_v18 = vmul.f32 0.1, %v950_v8  ;;  %v951_v20 = vadd.f32 %v1193_v52, %v905_v11 }
 0x126   : > { %v1218_v19 = vpack.c.bf16 %v970_v16, %v969_v15  ;;  %v967_v21 = vsel %vm953_vm3, %v946_v2, %v960_v10  ;;  %vm957_vm5 = vcmp.ge.f32.partialorder %v950_v8, 0.0  ;;  %v968_v22 = vsel %vm954_vm4, %v947_v13, %v961_v17 }
 0x127   : > { %1009 = vst [vmem:[%s265_s9 + $0x18] sm:$0xf] %v1209_v14  ;;  %v1213_v23 = vpack.c.bf16 %v968_v22, %v967_v21  ;;  %vm958_vm6 = vcmp.ge.f32.partialorder %v951_v20, 0.0  ;;  %v965_v24 = vmul.f32 0.1, %v951_v20  ;;  %v971_v25 = vsel %vm957_vm5, %v950_v8, %v964_v18 }
 0x128   : > { %1225 = vst [vmem:[%s265_s9 + $0x8] sm:$0xff] %v1218_v19  }
 0x129   : > { %1214 = vst [vmem:[%s265_s9] sm:$0xff] %v1213_v23   ;;  %v972_v26 = vsel %vm958_vm6, %v951_v20, %v965_v24 }
 0x12a   : > { %v1223_v27 = vpack.c.bf16 %v972_v26, %v971_v25 }
 0x12c   : > { %1226 = vst [vmem:[%s265_s9 + $0x10] sm:$0xff] %v1223_v27  }
 0x12d PF: > { %s13_s14 = sadd.s32 1, %s1472_s14   ;;  %s1681_s12 = smov %s1468_s13 }
 0x12e   : > { %p10_p5 = scmp.ge.s32.totalorder %s13_s14, 4   ;;  %s1682_s13 = smov %s1684_s15 }
 0x130   :  { %12 = sbr.rel (!%p10_p5) target bundleno = 2 (0x2), region = 76 }

// kernel: yolo_forward.4
= control target key start
LH: loop header
LB: loop body
LE: loop exit
PB: predicated region body
PF: predicated region fallthrough
CT: control target
= control target key end

     0   :  { %s1410_s12 = smov 0   ;;  %s1412_s13 = smov 0   ;;  %s1527_s0 = inlined_call_operand.vmem [shape: bf16[8,2048], index: 0, kind: input, shape index: {}]   ;;  %s1528_s1 = inlined_call_operand.vmem [shape: bf16[2048,128], index: 1, kind: input, shape index: {}]   ;;  %s1529_s2 = inlined_call_operand.vmem [shape: f32[1,128], index: 2, kind: input, shape index: {}]   ;;  %s1530_s3 = inlined_call_operand.vmem [shape: bf16[8,128], index: 3, kind: output, shape index: {}]  }
   0x1   :  { %s1414_s14 = smov 0  }
   0x2 LB: > { %s25_s15 = sadd.s32 1, %s1383_s13  ;;  %p1097_p0 = scmp.ge.s32.totalorder %s1387_s14, 1  ;;  %s1387_s14 = sphi %s1414_s14, %s13_s14   ;;  %s1383_s13 = sphi %s1412_s13, %s1532_s13   ;;  %s1379_s12 = sphi %s1410_s12, %s1531_s12  }
   0x3   : > { %p26_p1 = scmp.ge.s32.totalorder %s25_s15, 2  ;;  %p189_p2 = scmp.lt.s32.totalorder %s1387_s14, 3 }
   0x5   : > { %s1534_s15 = smov (%p26_p1, %s25_s15), 0  ;;  %p190_p3 = pnand %p1097_p0, %p189_p2 }
   0x6   : > { %s1098_s16 = sshll.u32 (!%p190_p3), %s1379_s12, 3  ;;  %s1100_s17 = sshll.u32 (!%p190_p3), %s1379_s12, 7 }
   0x7   : > { %193 = sbr.rel (%p190_p3) target bundleno = 326 (0x146), region = 32  ;;  %p233_p4 = scmp.lt.s32.totalorder (!%p190_p3), %s1098_s16, 15 }
   0x8   : > { %p241_p5 = scmp.lt.s32.totalorder (!%p190_p3), %s1100_s17, 255  ;;  %p1102_p6 = scmp.ne.s32.totalorder (!%p190_p3), %s1379_s12, 0 }
   0xe   : > { %s1536_s16 = smov (!%p233_p4, %s1098_s16), 15  ;;  %s1538_s17 = smov (!%p241_p5, %s1100_s17), 255 }
   0xf   : > { %s1099_s18 = sshll.u32 %s1536_s16, 2  ;;  %s1101_s22 = sshll.u32 %s1538_s17, 2  ;;  %v1389_v0 = vmov (!%p1102_p6), 0.0  }
  0x10   : > { %s1435_s21 = scalar_lea.vmem %s1527_s0, %s1099_s18  ;;  %s1440_s25 = scalar_lea.vmem %s1528_s1, %s1101_s22  ;;  %264 = vst [vmem:[#allocation2] sm:$0xff] (!%p1102_p6), %v1389_v0 }
  0x11   : > { %263 = sbr.rel (%p1102_p6) target bundleno = 24 (0x18), region = 36 }
  0x18 PF: > { %v1293_v1 = vld [vmem:[%s1440_s25 + $0x40] sm:$0xff]   ;;  %v1297_v5 = vld [vmem:[%s1440_s25 + $0x48] sm:$0xff]   ;;  %v1301_v9 = vld [vmem:[%s1440_s25 + $0x50] sm:$0xff]   ;;  %p1175_p7 = scmp.ne.s32.totalorder %s1379_s12, 1 }
  0x19   : > { %v1294_v2 = vld [vmem:[%s1440_s25 + $0xc0] sm:$0xff]   ;;  %1180 = vmatprep.subr.bf16.mxu0 %v1293_v1  ;;  %v1298_v6 = vld [vmem:[%s1440_s25 + $0xc8] sm:$0xff]   ;;  %v1302_v10 = vld [vmem:[%s1440_s25 + $0xd0] sm:$0xff]  }
  0x1a   : > { %v1295_v3 = vld [vmem:[%s1440_s25] sm:$0xff]   ;;  %1202 = vmatprep.subr.bf16.mxu1 %v1294_v2  ;;  %v1299_v7 = vld [vmem:[%s1440_s25 + $0x8] sm:$0xff]   ;;  %v1303_v11 = vld [vmem:[%s1440_s25 + $0x10] sm:$0xff]  }
  0x1b   : > { %v1296_v4 = vld [vmem:[%s1440_s25 + $0x80] sm:$0xff]   ;;  %1181 = vmatpush3.bf16.msra.mxu0 %v1295_v3  ;;  %v1300_v8 = vld [vmem:[%s1440_s25 + $0x88] sm:$0xff]   ;;  %v1304_v12 = vld [vmem:[%s1440_s25 + $0x90] sm:$0xff]  }
  0x1c   : > { %1203 = vmatpush3.bf16.msra.mxu1 %v1296_v4  ;;  %1182 = vmatprep.subr.bf16.mxu0 %v1297_v5  ;;  %v1305_v13 = vld [vmem:[%s1440_s25 + $0x58] sm:$0xff]   ;;  %v1309_v17 = vld [vmem:[%s1440_s25 + $0x60] sm:$0xff]   ;;  %v1313_v21 = vld [vmem:[%s1440_s25 + $0x68] sm:$0xff]  }
  0x1d   : > { %1204 = vmatprep.subr.bf16.mxu1 %v1298_v6  ;;  %v1306_v14 = vld [vmem:[%s1440_s25 + $0xd8] sm:$0xff]   ;;  %v1310_v18 = vld [vmem:[%s1440_s25 + $0xe0] sm:$0xff]   ;;  %v1314_v22 = vld [vmem:[%s1440_s25 + $0xe8] sm:$0xff]  }
  0x1e   : > { %v1307_v15 = vld [vmem:[%s1440_s25 + $0x18] sm:$0xff]   ;;  %v1311_v19 = vld [vmem:[%s1440_s25 + $0x20] sm:$0xff]   ;;  %v1315_v23 = vld [vmem:[%s1440_s25 + $0x28] sm:$0xff]  }
  0x1f   : > { %1183 = vmatpush3.bf16.msra.mxu0 %v1299_v7  ;;  %v1308_v16 = vld [vmem:[%s1440_s25 + $0x98] sm:$0xff]   ;;  %v1312_v20 = vld [vmem:[%s1440_s25 + $0xa0] sm:$0xff]   ;;  %v1316_v24 = vld [vmem:[%s1440_s25 + $0xa8] sm:$0xff]  }
  0x20   : > { %1205 = vmatpush3.bf16.msra.mxu1 %v1300_v8  ;;  %1184 = vmatprep.subr.bf16.mxu0 %v1301_v9  ;;  %v1317_v25 = vld [vmem:[%s1440_s25 + $0x70] sm:$0xff]   ;;  %v1321_v29 = vld [vmem:[%s1440_s25 + $0x78] sm:$0xff]   ;;  %v266_v33 = vld [vmem:[%s1435_s21] sm:$0xff] }
  0x21   : > { %1206 = vmatprep.subr.bf16.mxu1 %v1302_v10  ;;  %v1318_v26 = vld [vmem:[%s1440_s25 + $0xf0] sm:$0xff]   ;;  %v1322_v30 = vld [vmem:[%s1440_s25 + $0xf8] sm:$0xff]   ;;  %v267_v34 = vld [vmem:[%s1435_s21 + $0x8] sm:$0xff]  ;;  %v1103_v35 = vcombine.low %v266_v33, %v266_v33  ;;  %v1104_v36 = vcombine.high %v266_v33, %v266_v33 }
  0x22   : > { %v1319_v27 = vld [vmem:[%s1440_s25 + $0x30] sm:$0xff]   ;;  %v1323_v31 = vld [vmem:[%s1440_s25 + $0x38] sm:$0xff]   ;;  %v1105_v37 = vcombine.low %v267_v34, %v267_v34  ;;  %v1106_v38 = vcombine.high %v267_v34, %v267_v34  ;;  %v1329_v39 = vld [vmem:[%s1440_s25 + $0x140] sm:$0xff]  }
  0x23   : > { %1185 = vmatpush3.bf16.msra.mxu0 %v1303_v11  ;;  %v1320_v28 = vld [vmem:[%s1440_s25 + $0xb0] sm:$0xff]   ;;  %v1324_v32 = vld [vmem:[%s1440_s25 + $0xb8] sm:$0xff]   ;;  %v1330_v40 = vld [vmem:[%s1440_s25 + $0x1c0] sm:$0xff]   ;;  %842 = vmatprep.mubr.bf16.mxu0 %v1104_v36 }
  0x24   : > { %1207 = vmatpush3.bf16.msra.mxu1 %v1304_v12  ;;  %1186 = vmatprep.subr.bf16.mxu0 %v1305_v13  ;;  %v1331_v41 = vld [vmem:[%s1440_s25 + $0x100] sm:$0xff]   ;;  %v1333_v43 = vld [vmem:[%s1440_s25 + $0x148] sm:$0xff]   ;;  %v1337_v47 = vld [vmem:[%s1440_s25 + $0x150] sm:$0xff]  }
  0x25   : > { %1208 = vmatprep.subr.bf16.mxu1 %v1306_v14  ;;  %882 = vmatprep.mubr.bf16.mxu1 %v1106_v38  ;;  %v1332_v42 = vld [vmem:[%s1440_s25 + $0x180] sm:$0xff]   ;;  %v1334_v44 = vld [vmem:[%s1440_s25 + $0x1c8] sm:$0xff]   ;;  %v1338_v48 = vld [vmem:[%s1440_s25 + $0x1d0] sm:$0xff]  }
  0x26   : > { %v1335_v45 = vld [vmem:[%s1440_s25 + $0x108] sm:$0xff]   ;;  %v1339_v49 = vld [vmem:[%s1440_s25 + $0x110] sm:$0xff]   ;;  %v1341_v51 = vld [vmem:[%s1440_s25 + $0x158] sm:$0xff]  }
  0x27   : > { %1187 = vmatpush3.bf16.msra.mxu0 %v1307_v15  ;;  %v1336_v46 = vld [vmem:[%s1440_s25 + $0x188] sm:$0xff]   ;;  %v1340_v50 = vld [vmem:[%s1440_s25 + $0x190] sm:$0xff]   ;;  %v1342_v52 = vld [vmem:[%s1440_s25 + $0x1d8] sm:$0xff]  }
  0x28   : > { %1209 = vmatpush3.bf16.msra.mxu1 %v1308_v16  ;;  %1188 = vmatprep.subr.bf16.mxu0 %v1309_v17  ;;  %v1343_v53 = vld [vmem:[%s1440_s25 + $0x118] sm:$0xff]   ;;  %v1345_v55 = vld [vmem:[%s1440_s25 + $0x160] sm:$0xff]   ;;  %v1349_v59 = vld [vmem:[%s1440_s25 + $0x168] sm:$0xff]  }
  0x29   : > { %1210 = vmatprep.subr.bf16.mxu1 %v1310_v18  ;;  %v1344_v54 = vld [vmem:[%s1440_s25 + $0x198] sm:$0xff]   ;;  %v1346_v56 = vld [vmem:[%s1440_s25 + $0x1e0] sm:$0xff]   ;;  %v1350_v60 = vld [vmem:[%s1440_s25 + $0x1e8] sm:$0xff]  }
  0x2a   : > { %v1347_v57 = vld [vmem:[%s1440_s25 + $0x120] sm:$0xff]   ;;  %v1351_v61 = vld [vmem:[%s1440_s25 + $0x128] sm:$0xff]   ;;  %v1353_v63 = vld [vmem:[%s1440_s25 + $0x170] sm:$0xff]  }
  0x2b   : > { %1189 = vmatpush3.bf16.msra.mxu0 %v1311_v19  ;;  %v1348_v58 = vld [vmem:[%s1440_s25 + $0x1a0] sm:$0xff]   ;;  %v1352_v62 = vld [vmem:[%s1440_s25 + $0x1a8] sm:$0xff]   ;;  %v1354_v0 = vld [vmem:[%s1440_s25 + $0x1f0] sm:$0xff]  }
  0x2c   : > { %1211 = vmatpush3.bf16.msra.mxu1 %v1312_v20  ;;  %1190 = vmatprep.subr.bf16.mxu0 %v1313_v21  ;;  %v1355_v1 = vld [vmem:[%s1440_s25 + $0x130] sm:$0xff]   ;;  %v1357_v3 = vld [vmem:[%s1440_s25 + $0x178] sm:$0xff]  }
  0x2d   : > { %1212 = vmatprep.subr.bf16.mxu1 %v1314_v22  ;;  %v1356_v2 = vld [vmem:[%s1440_s25 + $0x1b0] sm:$0xff]   ;;  %v1358_v4 = vld [vmem:[%s1440_s25 + $0x1f8] sm:$0xff]  }
  0x2e   : > { %v1359_v5 = vld [vmem:[%s1440_s25 + $0x138] sm:$0xff]   ;;  %v268_v7 = vld [vmem:[%s1435_s21 + $0x10] sm:$0xff] }
  0x2f   : > { %1191 = vmatpush3.bf16.msra.mxu0 %v1315_v23  ;;  %v1360_v6 = vld [vmem:[%s1440_s25 + $0x1b8] sm:$0xff]   ;;  %v1107_v8 = vcombine.low %v268_v7, %v268_v7  ;;  %v1108_v9 = vcombine.high %v268_v7, %v268_v7 }
  0x30   : > { %1213 = vmatpush3.bf16.msra.mxu1 %v1316_v24  ;;  %1192 = vmatprep.subr.bf16.mxu0 %v1317_v25  ;;  %v269_v10 = vld [vmem:[%s1435_s21 + $0x18] sm:$0xff] }
  0x31   : > { %1214 = vmatprep.subr.bf16.mxu1 %v1318_v26  ;;  %v1109_v11 = vcombine.low %v269_v10, %v269_v10  ;;  %v1110_v12 = vcombine.high %v269_v10, %v269_v10 }
  0x33   : > { %1193 = vmatpush3.bf16.msra.mxu0 %v1319_v27 }
  0x34   : > { %1215 = vmatpush3.bf16.msra.mxu1 %v1320_v28  ;;  %1194 = vmatprep.subr.bf16.mxu0 %v1321_v29 }
  0x35   : > { %1216 = vmatprep.subr.bf16.mxu1 %v1322_v30 }
  0x37   : > { %1195 = vmatpush3.bf16.msra.mxu0 %v1323_v31 }
  0x38   : > { %1217 = vmatpush3.bf16.msra.mxu1 %v1324_v32  ;;  %1224 = vmatprep.subr.bf16.mxu0 %v1329_v39  ;;  %v1176_v39 = vld [vmem:[%s1529_s2] ss:$0 sm:$0xff] (!%p1175_p7) }
  0x39   : > { %1246 = vmatprep.subr.bf16.mxu1 %v1330_v40 }
  0x3a   : > { %843 = vmatmul.mubr.bf16.vlgmr.msra.gmra.mrb[0].mxu0 %v1103_v35  ;;  %v265_v35 = vld [vmem:[#allocation2] sm:$0xff] }
  0x3b   : > { %883 = vmatmul.mubr.bf16.vlgmr.msra.gmra.mrb[0].mxu1 %v1105_v37  ;;  %1225 = vmatpush3.bf16.msra.mxu0 %v1331_v41 }
  0x3c   : > { %1247 = vmatpush3.bf16.msra.mxu1 %v1332_v42  ;;  %1226 = vmatprep.subr.bf16.mxu0 %v1333_v43 }
  0x3d   : > { %1248 = vmatprep.subr.bf16.mxu1 %v1334_v44  ;;  %922 = vmatprep.mubr.bf16.mxu0 %v1108_v9 }
  0x3e   : > { %962 = vmatprep.mubr.bf16.mxu1 %v1110_v12 }
  0x3f   : > { %1227 = vmatpush3.bf16.msra.mxu0 %v1335_v45 }
  0x40   : > { %1249 = vmatpush3.bf16.msra.mxu1 %v1336_v46  ;;  %1228 = vmatprep.subr.bf16.mxu0 %v1337_v47 }
  0x41   : > { %1250 = vmatprep.subr.bf16.mxu1 %v1338_v48 }
  0x43   : > { %1229 = vmatpush3.bf16.msra.mxu0 %v1339_v49 }
  0x44   : > { %1251 = vmatpush3.bf16.msra.mxu1 %v1340_v50  ;;  %1230 = vmatprep.subr.bf16.mxu0 %v1341_v51 }
  0x45   : > { %1252 = vmatprep.subr.bf16.mxu1 %v1342_v52 }
  0x47   : > { %1231 = vmatpush3.bf16.msra.mxu0 %v1343_v53 }
  0x48   : > { %1253 = vmatpush3.bf16.msra.mxu1 %v1344_v54  ;;  %1232 = vmatprep.subr.bf16.mxu0 %v1345_v55 }
  0x49   : > { %1254 = vmatprep.subr.bf16.mxu1 %v1346_v56 }
  0x4b   : > { %1233 = vmatpush3.bf16.msra.mxu0 %v1347_v57 }
  0x4c   : > { %1255 = vmatpush3.bf16.msra.mxu1 %v1348_v58  ;;  %1234 = vmatprep.subr.bf16.mxu0 %v1349_v59 }
  0x4d   : > { %1256 = vmatprep.subr.bf16.mxu1 %v1350_v60 }
  0x4f   : > { %1235 = vmatpush3.bf16.msra.mxu0 %v1351_v61 }
  0x50   : > { %1257 = vmatpush3.bf16.msra.mxu1 %v1352_v62  ;;  %1236 = vmatprep.subr.bf16.mxu0 %v1353_v63 }
  0x51   : > { %1258 = vmatprep.subr.bf16.mxu1 %v1354_v0 }
  0x53   : > { %1237 = vmatpush3.bf16.msra.mxu0 %v1355_v1 }
  0x54   : > { %1259 = vmatpush3.bf16.msra.mxu1 %v1356_v2  ;;  %1238 = vmatprep.subr.bf16.mxu0 %v1357_v3 }
  0x55   : > { %1260 = vmatprep.subr.bf16.mxu1 %v1358_v4 }
  0x57   : > { %1239 = vmatpush3.bf16.msra.mxu0 %v1359_v5 }
  0x58   : > { %1261 = vmatpush3.bf16.msra.mxu1 %v1360_v6 }
  0x5a   : > { %923 = vmatmul.mubr.bf16.vlgmr.msra.gmra.mrb[4].mxu0 %v1107_v8 }
  0x5b   : > { %963 = vmatmul.mubr.bf16.vlgmr.msra.gmra.mrb[4].mxu1 %v1109_v11 }
 0x10d   : > { %v1196_v13 = vpop.f32.mrb[0].mxu0 }
 0x10e   : > { %v1218_v14 = vpop.f32.mrb[0].mxu1  ;;  %v1197_v15 = vpop.f32.mrb[1].mxu0 }
 0x10f   : > { %v1219_v16 = vpop.f32.mrb[1].mxu1  ;;  %v1198_v17 = vadd.f32 %v1197_v15, %v1196_v13  ;;  %v1199_v19 = vpop.f32.mrb[2].mxu0 }
 0x110   : > { %v1220_v18 = vadd.f32 %v1219_v16, %v1218_v14  ;;  %v1221_v20 = vpop.f32.mrb[2].mxu1  ;;  %v1200_v21 = vpop.f32.mrb[3].mxu0 }
 0x111   : > { %v1222_v22 = vpop.f32.mrb[3].mxu1 }
 0x112   : > { %v885_v23 = vadd.f32 %v1220_v18, %v1198_v17 }
 0x12d   : > { %v1240_v24 = vpop.f32.mrb[4].mxu0 }
 0x12e   : > { %v1262_v25 = vpop.f32.mrb[4].mxu1  ;;  %v1241_v26 = vpop.f32.mrb[5].mxu0 }
 0x12f   : > { %v1263_v27 = vpop.f32.mrb[5].mxu1  ;;  %v1242_v28 = vadd.f32 %v1241_v26, %v1240_v24  ;;  %v1243_v30 = vpop.f32.mrb[6].mxu0 }
 0x130   : > { %v1264_v29 = vadd.f32 %v1263_v27, %v1262_v25  ;;  %v1265_v31 = vpop.f32.mrb[6].mxu1  ;;  %v1244_v32 = vpop.f32.mrb[7].mxu0 }
 0x131   : > { %v1266_v33 = vpop.f32.mrb[7].mxu1  ;;  %v925_v34 = vadd.f32 %v1242_v28, %v885_v23  ;;  %975 = sbr.rel (%p1175_p7) target bundleno = 326 (0x146), region = 40 }
 0x133   : > { %v965_v36 = vadd.f32 %v1264_v29, %v925_v34 }
 0x135   : > { %v970_v37 = vadd.f32 %v965_v36, %v265_v35 }
 0x137   : > { %971 = vst [vmem:[#allocation2] sm:$0xff] %v970_v37 }
 0x13e   : > { %v976_v38 = vld [vmem:[#allocation2] sm:$0xff] }
 0x13f   : > { %v984_v40 = vadd.f32 %v1176_v39, %v976_v38 }
 0x141   : > { %v985_v41 = vmax.f32 %v984_v40, 0.0 }
 0x143   : > { %v986_v42 = vpack.c.bf16 %v985_v41, %v985_v41 }
 0x145   : > { %987 = vst [vmem:[%s1530_s3] sm:$0xf] %v986_v42 }
 0x146 PF: > { %s13_s14 = sadd.s32 1, %s1387_s14   ;;  %s1531_s12 = smov %s1383_s13 }
 0x147   : > { %p10_p8 = scmp.ge.s32.totalorder %s13_s14, 4   ;;  %s1532_s13 = smov %s1534_s15 }
 0x149   :  { %12 = sbr.rel (!%p10_p8) target bundleno = 2 (0x2), region = 76 }

// kernel: yolo_forward.5
= control target key start
LH: loop header
LB: loop body
LE: loop exit
PB: predicated region body
PF: predicated region fallthrough
CT: control target
= control target key end

     0   :  { %s800_s12 = smov 0   ;;  %s802_s13 = smov 0   ;;  %s889_s0 = inlined_call_operand.vmem [shape: bf16[8,128], index: 0, kind: input, shape index: {}]   ;;  %s890_s1 = inlined_call_operand.vmem [shape: bf16[128,1792], index: 1, kind: input, shape index: {}]   ;;  %s891_s2 = inlined_call_operand.vmem [shape: f32[1,1792], index: 2, kind: input, shape index: {}]   ;;  %s892_s3 = inlined_call_operand.vmem [shape: f32[8,1792], index: 3, kind: output, shape index: {}]  }
   0x1   :  { %s804_s14 = smov 0   ;;  %s806_s15 = smov 0  }
   0x2   :  { %s808_s16 = smov 0  }
   0x3 LB: > { %s28_s17 = sadd.s32 1, %s773_s15  ;;  %p76_p1 = scmp.ne.s32.totalorder %s765_s13, %s761_s12  ;;  %s777_s16 = sphi %s808_s16, %s13_s16   ;;  %s773_s15 = sphi %s806_s15, %s896_s15   ;;  %s769_s14 = sphi %s804_s14, %s895_s14   ;;  %s765_s13 = sphi %s802_s13, %s894_s13   ;;  %s761_s12 = sphi %s800_s12, %s893_s12  }
   0x4   : > { %p30_p0 = scmp.ge.s32.totalorder %s28_s17, 7  ;;  %p77_p2 = scmp.eq.s32.totalorder %s777_s16, 0 }
   0x5   : > { %s69_s19 = sadd.s32 1, %s765_s13  ;;  %p646_p5 = scmp.ge.s32.totalorder %s777_s16, 7 }
   0x6   : > { %s898_s17 = smov (%p30_p0, %s28_s17), 0  ;;  %p78_p3 = por %p77_p2, %p76_p1 }
   0x7   : > { %s65_s18 = ssub.s32 %s773_s15, %s898_s17  ;;  %166 = sbr.rel (%p646_p5) target bundleno = 26 (0x1a), region = 20 }
   0x8   : > { %p67_p4 = scmp.eq.s32.totalorder %s65_s18, 0 }
   0xa   : > { %s835_s20 = scalar_select %p67_p4, %s765_s13, %s69_s19  }
   0xe   : > { %169 = sbr.rel (!%p78_p3) target bundleno = 26 (0x1a), region = 24  ;;  %s171_s21 = sand.u32 (%p78_p3), 1, %s765_s13  }
   0xf   : > { %s673_s22 = sshll.u32 (%p78_p3), %s773_s15, 3  ;;  %s647_s23 = sshll.u32 (%p78_p3), %s171_s21, 7 }
  0x10   : > { %s843_s26 = scalar_lea.vmem (%p78_p3), %s890_s1, %s673_s22  ;;  %s173_s27 = scalar_lea.vmem (%p78_p3), [#allocation3], %s647_s23 }
  0x11   : > { %v237_v0 = vld [vmem:[%s843_s26] sm:$0xff] (%p78_p3)  ;;  %v239_v1 = vld [vmem:[%s843_s26 + $0x38] sm:$0xff] (%p78_p3)  ;;  %v241_v2 = vld [vmem:[%s843_s26 + $0x70] sm:$0xff] (%p78_p3) }
  0x12   : > { %238 = vst [vmem:[%s173_s27] sm:$0xff] (%p78_p3), %v237_v0  ;;  %240 = vst [vmem:[%s173_s27 + $0x8] sm:$0xff] (%p78_p3), %v239_v1  ;;  %v243_v3 = vld [vmem:[%s843_s26 + $0xa8] sm:$0xff] (%p78_p3)  ;;  %v245_v4 = vld [vmem:[%s843_s26 + $0xe0] sm:$0xff] (%p78_p3) }
  0x13   : > { %242 = vst [vmem:[%s173_s27 + $0x10] sm:$0xff] (%p78_p3), %v241_v2  ;;  %v247_v5 = vld [vmem:[%s843_s26 + $0x118] sm:$0xff] (%p78_p3)  ;;  %244 = vst [vmem:[%s173_s27 + $0x18] sm:$0xff] (%p78_p3), %v243_v3  ;;  %v249_v6 = vld [vmem:[%s843_s26 + $0x150] sm:$0xff] (%p78_p3) }
  0x14   : > { %246 = vst [vmem:[%s173_s27 + $0x20] sm:$0xff] (%p78_p3), %v245_v4  ;;  %248 = vst [vmem:[%s173_s27 + $0x28] sm:$0xff] (%p78_p3), %v247_v5  ;;  %v251_v7 = vld [vmem:[%s843_s26 + $0x188] sm:$0xff] (%p78_p3)  ;;  %v253_v8 = vld [vmem:[%s843_s26 + $0x1c0] sm:$0xff] (%p78_p3) }
  0x15   : > { %250 = vst [vmem:[%s173_s27 + $0x30] sm:$0xff] %v249_v6  ;;  %252 = vst [vmem:[%s173_s27 + $0x38] sm:$0xff] %v251_v7  ;;  %v255_v9 = vld [vmem:[%s843_s26 + $0x1f8] sm:$0xff]  ;;  %v257_v10 = vld [vmem:[%s843_s26 + $0x230] sm:$0xff] }
  0x16   : > { %254 = vst [vmem:[%s173_s27 + $0x40] sm:$0xff] %v253_v8  ;;  %v259_v11 = vld [vmem:[%s843_s26 + $0x268] sm:$0xff]  ;;  %256 = vst [vmem:[%s173_s27 + $0x48] sm:$0xff] %v255_v9  ;;  %v261_v12 = vld [vmem:[%s843_s26 + $0x2a0] sm:$0xff] }
  0x17   : > { %258 = vst [vmem:[%s173_s27 + $0x50] sm:$0xff] %v257_v10  ;;  %260 = vst [vmem:[%s173_s27 + $0x58] sm:$0xff] %v259_v11  ;;  %v263_v13 = vld [vmem:[%s843_s26 + $0x2d8] sm:$0xff]  ;;  %v265_v14 = vld [vmem:[%s843_s26 + $0x310] sm:$0xff] }
  0x18   : > { %262 = vst [vmem:[%s173_s27 + $0x60] sm:$0xff] %v261_v12  ;;  %264 = vst [vmem:[%s173_s27 + $0x68] sm:$0xff] %v263_v13  ;;  %v267_v15 = vld [vmem:[%s843_s26 + $0x348] sm:$0xff] }
  0x19   : > { %266 = vst [vmem:[%s173_s27 + $0x70] sm:$0xff] %v265_v14  ;;  %268 = vst [vmem:[%s173_s27 + $0x78] sm:$0xff] %v267_v15 }
  0x1a PF: > { %p650_p6 = scmp.ge.s32.totalorder %s777_s16, 1  ;;  %p281_p7 = scmp.lt.s32.totalorder %s777_s16, 8 }
  0x1c   : > { %p282_p8 = pnand %p650_p6, %p281_p7 }
  0x1d   : > { %s288_s28 = sand.u32 (!%p282_p8), 1, %s761_s12   ;;  %v779_v16 = vmov (!%p282_p8), 0   ;;  %v359_v33 = vld [vmem:[%s889_s0] sm:$0xf] (!%p282_p8)  ;;  %s652_s6 = sshll.u32 (!%p282_p8), %s769_s14, 1  ;;  %v508_v34 = vlaneseq (!%p282_p8) }
  0x1e   : > { %285 = sbr.rel (%p282_p8) target bundleno = 281 (0x119), region = 66  ;;  %s651_s29 = sshll.u32 (!%p282_p8), %s288_s28, 7  ;;  %488 = vmatprep.mubr.bf16.mxu0 (!%p282_p8), %v779_v16 }
  0x1f   : > { %s290_s30 = scalar_lea.vmem (!%p282_p8), [#allocation3], %s651_s29  ;;  %p336_p9 = scmp.lt.s32.totalorder (!%p282_p8), %s652_s6, 13  ;;  %v509_v35 = vshrl.u32 (!%p282_p8), %v508_v34, 7 }
  0x20   : > { %v715_v17 = vld [vmem:[%s290_s30 + $0x4] ss:$8 sps:$4 sm:$0xff] (!%p282_p8)   ;;  %v717_v18 = vld [vmem:[%s290_s30] ss:$8 sps:$4 sm:$0xff] (!%p282_p8)   ;;  %v718_v19 = vld [vmem:[%s290_s30 + $0x14] ss:$8 sps:$4 sm:$0xff] (!%p282_p8)  }
  0x21   : > { %456 = vmatprep.subr.bf16.mxu0 (!%p282_p8), %v715_v17  ;;  %v720_v20 = vld [vmem:[%s290_s30 + $0x10] ss:$8 sps:$4 sm:$0xff] (!%p282_p8)   ;;  %v721_v21 = vld [vmem:[%s290_s30 + $0x24] ss:$8 sps:$4 sm:$0xff] (!%p282_p8)   ;;  %v723_v22 = vld [vmem:[%s290_s30 + $0x20] ss:$8 sps:$4 sm:$0xff] (!%p282_p8)  }
  0x22   : > { %457 = vmatpush1.bf16.msra.mxu0 (!%p282_p8), %v717_v18  ;;  %v724_v23 = vld [vmem:[%s290_s30 + $0x34] ss:$8 sps:$4 sm:$0xff] (!%p282_p8)   ;;  %v726_v24 = vld [vmem:[%s290_s30 + $0x30] ss:$8 sps:$4 sm:$0xff] (!%p282_p8)   ;;  %v727_v25 = vld [vmem:[%s290_s30 + $0x44] ss:$8 sps:$4 sm:$0xff] (!%p282_p8)  }
  0x23   : > { %458 = vmatprep.subr.bf16.mxu0 (!%p282_p8), %v718_v19  ;;  %v729_v26 = vld [vmem:[%s290_s30 + $0x40] ss:$8 sps:$4 sm:$0xff] (!%p282_p8)   ;;  %v730_v27 = vld [vmem:[%s290_s30 + $0x54] ss:$8 sps:$4 sm:$0xff] (!%p282_p8)   ;;  %v732_v28 = vld [vmem:[%s290_s30 + $0x50] ss:$8 sps:$4 sm:$0xff] (!%p282_p8)  }
  0x24   : > { %v733_v29 = vld [vmem:[%s290_s30 + $0x64] ss:$8 sps:$4 sm:$0xff] (!%p282_p8)   ;;  %v735_v30 = vld [vmem:[%s290_s30 + $0x60] ss:$8 sps:$4 sm:$0xff] (!%p282_p8)   ;;  %v736_v31 = vld [vmem:[%s290_s30 + $0x74] ss:$8 sps:$4 sm:$0xff] (!%p282_p8)  }
  0x25   : > { %v738_v32 = vld [vmem:[%s290_s30 + $0x70] ss:$8 sps:$4 sm:$0xff]   ;;  %s900_s6 = smov (!%p336_p9, %s652_s6), 13  ;;  %v510_v36 = vsub.s32 0, %v509_v35  ;;  %v514_v38 = vsub.s32 1, %v509_v35 }
  0x26   : > { %459 = vmatpush1.bf16.msra.mxu0 %v720_v20  ;;  %s338_s9 = scalar_lea.vmem %s891_s2, %s900_s6  ;;  %s654_s10 = sshll.u32 %s900_s6, 3 }
  0x27   : > { %460 = vmatprep.subr.bf16.mxu0 %v721_v21  ;;  %v506_v37 = vld [vmem:[%s338_s9] sm:$0x3]  ;;  %s348_s18 = scalar_lea.vmem %s892_s3, %s654_s10 }
  0x28   : > { %v511_v39 = vrot.slane %v506_v37, %v510_v36  ;;  %v515_v40 = vrot.slane %v506_v37, %v514_v38 }
  0x2a   : > { %461 = vmatpush1.bf16.msra.mxu0 %v723_v22 }
  0x2b   : > { %462 = vmatprep.subr.bf16.mxu0 %v724_v23 }
  0x2e   : > { %463 = vmatpush1.bf16.msra.mxu0 %v726_v24 }
  0x2f   : > { %464 = vmatprep.subr.bf16.mxu0 %v727_v25 }
  0x32   : > { %465 = vmatpush1.bf16.msra.mxu0 %v729_v26 }
  0x33   : > { %466 = vmatprep.subr.bf16.mxu0 %v730_v27 }
  0x36   : > { %467 = vmatpush1.bf16.msra.mxu0 %v732_v28 }
  0x37   : > { %468 = vmatprep.subr.bf16.mxu0 %v733_v29 }
  0x3a   : > { %469 = vmatpush1.bf16.msra.mxu0 %v735_v30 }
  0x3b   : > { %470 = vmatprep.subr.bf16.mxu0 %v736_v31 }
  0x3e   : > { %471 = vmatpush1.bf16.msra.mxu0 %v738_v32 }
  0x41   : > { %489 = vmatmul.mubr.bf16.vlgmr.msra.gmra.mrb[0].mxu0 %v359_v33 }
 0x114   : > { %v490_v41 = vpop.f32.mrb[0].mxu0 }
 0x115   : > { %v518_v42 = vadd.f32 %v511_v39, %v490_v41  ;;  %v492_v43 = vpop.f32.mrb[1].mxu0 }
 0x116   : > { %v519_v44 = vadd.f32 %v515_v40, %v492_v43  ;;  %v494_v45 = vpop.f32.mrb[2].mxu0 }
 0x117   : > { %520 = vst [vmem:[%s348_s18] sm:$0xff] %v518_v42  ;;  %v495_v46 = vpop.f32.mrb[3].mxu0 }
 0x118   : > { %521 = vst [vmem:[%s348_s18 + $0x8] sm:$0xff] %v519_v44 }
 0x119 PF: > { %s13_s16 = sadd.s32 1, %s777_s16   ;;  %s893_s12 = smov %s765_s13 }
 0x11a   : > { %p10_p10 = scmp.ge.s32.totalorder %s13_s16, 9   ;;  %s894_s13 = smov %s835_s20 }
 0x11b   : > { %s895_s14 = smov %s773_s15  ;;  %s896_s15 = smov %s898_s17 }
 0x11c   :  { %12 = sbr.rel (!%p10_p10) target bundleno = 3 (0x3), region = 119 }

</bundles_post_ra>
